<compile_context>
chip_gen: v5e
topology: v5e:2x2
jax: 0.10.0
libtpu: 0.0.40
codegen_flags: <defaults>
</compile_context>

<pallas_src>
import functools
import math

import jax
import jax.numpy as jnp
from jax import lax
from jax.experimental import pallas as pl
from jax.experimental.pallas import tpu as pltpu


# --------------------------------------------------------------------------
# Fast path: table resident in VMEM, one-hot MXU gather with scale folded in.
# --------------------------------------------------------------------------
def token_embedding_vmem_kernel(ids_ref, table_ref, out_ref, *, scale):
    """ids_ref: (tm, 1) int32 VMEM; table_ref: (Vp, D) resident VMEM block."""
    ids = ids_ref[...]                                   # (tm, 1)
    tm = ids.shape[0]
    vp = table_ref.shape[0]
    onehot = (ids == lax.broadcasted_iota(jnp.int32, (tm, vp), 1)
              ).astype(table_ref.dtype)                  # (tm, Vp)
    gathered = jnp.dot(onehot, table_ref[...],
                       preferred_element_type=jnp.float32)
    out_ref[...] = (gathered * scale).astype(out_ref.dtype)


# --------------------------------------------------------------------------
# Large-vocab path: HBM row gather, deep DMA ring straight into out_ref.
# --------------------------------------------------------------------------
def token_embedding_hbm_kernel(ids_ref, table_hbm, out_ref, sem, *,
                               scale, tm, nsem, chunk):
    """One grid step gathers `tm` embedding rows from HBM via async DMAs.

    ids_ref   : (n_pad,) int32 token ids in SMEM (scalar prefetch)
    table_hbm : (V, D) embedding table left in HBM (memory_space=pl.ANY)
    out_ref   : (tm, D) output tile in VMEM (rows are DMA'd straight here)
    sem       : (nsem,) DMA semaphores -> up to `nsem` gathers in flight
    """
    base = pl.program_id(0) * tm

    def issue(t, slot):
        tok = ids_ref[base + t]
        pltpu.make_async_copy(
            table_hbm.at[pl.ds(tok, 1)],      # (1, D) row in HBM
            out_ref.at[pl.ds(t, 1)],          # (1, D) row in the output tile
            sem.at[slot],
        ).start()

    # Prime the DMA ring.
    n_prime = min(nsem, tm)

    @pl.loop(0, n_prime)
    def _(t):
        issue(t, t)

    # Steady state: wait for row t, reuse its slot for row t + nsem, and
    # scale finished rows in `chunk`-sized passes while later DMAs fly.
    @pl.loop(0, tm)
    def _(t):
        slot = t % nsem
        nxt = t + nsem
        # Hoist the SMEM id read for the prefetched row ABOVE the wait:
        # .wait() breaks SMEM sst->sld forwarding and would stall every iter.
        tok_next = ids_ref[base + jnp.where(nxt < tm, nxt, t)]

        # Wait for row t.  The descriptor only carries the copy size, which
        # is identical ((1, D), same dtype) for every copy in the ring, so the
        # semaphore bookkeeping matches the copies started by issue().
        pltpu.make_async_copy(
            table_hbm.at[pl.ds(0, 1)],
            out_ref.at[pl.ds(t, 1)],
            sem.at[slot],
        ).wait()

        @pl.when(nxt < tm)
        def _():
            pltpu.make_async_copy(
                table_hbm.at[pl.ds(tok_next, 1)],
                out_ref.at[pl.ds(nxt, 1)],
                sem.at[slot],
            ).start()

        # Fold sqrt(d_model) into chunk-sized passes right after those rows
        # have landed, overlapping the epilogue with outstanding DMAs.
        # (tm is a multiple of chunk, so every row is scaled exactly once.)
        @pl.when((t + 1) % chunk == 0)
        def _():
            start = pl.multiple_of(t + 1 - chunk, chunk)
            rows = out_ref[pl.ds(start, chunk), :]
            out_ref[pl.ds(start, chunk), :] = rows * scale


# --------------------------------------------------------------------------
# Wrapper
# --------------------------------------------------------------------------
def token_embedding(ids, table, d_model, *, tm=None, nsem=32,
                    vmem_table_bytes=4 * 1024 * 1024, force_hbm=False):
    """ids: [B, S] int, table: [V, D] float -> [B, S, D] same dtype as table."""
    B, S = ids.shape
    V, D = table.shape
    N = B * S
    scale = float(math.sqrt(d_model))
    itemsize = jnp.dtype(table.dtype).itemsize

    use_fast = (not force_hbm) and (V * D * itemsize <= vmem_table_bytes)

    # ---- token-tile size from an explicit VMEM budget ----------------------
    out_budget = 8 * 1024 * 1024                    # double-buffered out block
    tm_auto = out_budget // (2 * D * itemsize)
    vp = ((V + 7) // 8) * 8
    if use_fast:
        # Keep the (tm, Vp) one-hot intermediate modest as well.
        tm_auto = min(tm_auto, (2 * 1024 * 1024) // max(1, vp * itemsize))
    tm_eff = tm if tm is not None else min(512, int(tm_auto))
    tm_eff = min(tm_eff, ((N + 7) // 8) * 8)        # no bigger than padded N
    tm_eff = max(8, (tm_eff // 8) * 8)              # sublane-aligned
    n_pad = ((N + tm_eff - 1) // tm_eff) * tm_eff
    n_tiles = n_pad // tm_eff

    # Clamp ids (no OOB DMA / one-hot row possible) and pad to whole tiles.
    # Padded tail slots gather row 0 and are sliced off below (harmless).
    ids_flat = jnp.clip(ids.reshape(N).astype(jnp.int32), 0, V - 1)
    ids_flat = jnp.zeros((n_pad,), jnp.int32).at[:N].set(ids_flat)

    compiler_params = pltpu.CompilerParams(
        dimension_semantics=("parallel",),          # token tiles independent
        vmem_limit_bytes=32 * 1024 * 1024,          # safe on v5e/v6e/v7x
    )

    if use_fast:
        # Pad the vocab axis to a sublane multiple; clamped ids never hit the
        # padded rows, which are zero anyway.
        tbl = table if vp == V else jnp.pad(table, ((0, vp - V), (0, 0)))
        ids2d = ids_flat.reshape(n_pad, 1)
        out = pl.pallas_call(
            functools.partial(token_embedding_vmem_kernel, scale=scale),
            out_shape=jax.ShapeDtypeStruct((n_pad, D), table.dtype),
            grid_spec=pltpu.PrefetchScalarGridSpec(
                num_scalar_prefetch=0,
                grid=(n_tiles,),
                in_specs=[
                    pl.BlockSpec((tm_eff, 1), lambda i: (i, 0)),   # ids tile
                    pl.BlockSpec((vp, D), lambda i: (0, 0)),       # table, resident
                ],
                out_specs=pl.BlockSpec((tm_eff, D), lambda i: (i, 0)),
            ),
            compiler_params=compiler_params,
        )(ids2d, tbl)
    else:
        # NOTE: for very large B*S, block the ids per tile instead of scalar
        # prefetching the whole flattened array (SMEM pads 1-D arrays to the
        # next power of two); fine at typical per-call token counts.
        nsem_eff = int(max(1, min(nsem, tm_eff)))
        chunk = 8                                   # sublane-aligned scale pass
        out = pl.pallas_call(
            functools.partial(token_embedding_hbm_kernel, scale=scale,
                              tm=tm_eff, nsem=nsem_eff, chunk=chunk),
            out_shape=jax.ShapeDtypeStruct((n_pad, D), table.dtype),
            grid_spec=pltpu.PrefetchScalarGridSpec(
                num_scalar_prefetch=1,                          # ids -> SMEM
                grid=(n_tiles,),
                in_specs=[pl.BlockSpec(memory_space=pl.ANY)],   # table in HBM
                out_specs=pl.BlockSpec((tm_eff, D), lambda i, ids: (i, 0)),
                scratch_shapes=[pltpu.SemaphoreType.DMA((nsem_eff,))],
            ),
            compiler_params=compiler_params,
        )(ids_flat, table)

    return out[:N].reshape(B, S, D)


if __name__ == "__main__":
    # Small, deterministic config (D multiple of 128 -> lane-dense output).
    vocab_size = 64
    d_model = 128
    pad_idx = 0
    batch, seq = 2, 8

    key = jax.random.PRNGKey(0)
    k_tbl, k_ids = jax.random.split(key)

    # nn.Embedding(padding_idx=pad_idx): N(0, 1) init, padding row zeroed.
    table = jax.random.normal(k_tbl, (vocab_size, d_model), dtype=jnp.float32)
    table = table.at[pad_idx].set(0.0)

    # Token ids, include some pad tokens.
    ids = jax.random.randint(k_ids, (batch, seq), 0, vocab_size, dtype=jnp.int32)
    ids = ids.at[0, -2:].set(pad_idx)

    # Reference (plain JAX): embedding(x) * sqrt(d_model).
    ref = table[ids] * math.sqrt(d_model)

    # Fast path: table resident in VMEM, one-hot MXU gather.
    out_fast = jax.block_until_ready(token_embedding(ids, table, d_model))
    assert out_fast.shape == (batch, seq, d_model)
    assert jnp.allclose(out_fast, ref, atol=1e-4, rtol=1e-4)

    # Large-vocab path (forced here for coverage): HBM row-DMA ring into out.
    out_hbm = jax.block_until_ready(
        token_embedding(ids, table, d_model, force_hbm=True))
    assert out_hbm.shape == (batch, seq, d_model)
    assert jnp.allclose(out_hbm, ref, atol=1e-5, rtol=1e-5)

    print("KERNEL_OK")
</pallas_src>

<mosaic_0001>
module attributes {stable_mosaic.version = 11 : i64} {
  func.func @token_embedding_vmem_kernel(%arg0: i32, %arg1: memref<16x1xi32, #tpu.memory_space<vmem>>, %arg2: memref<64x128xf32, #tpu.memory_space<vmem>>, %arg3: memref<16x128xf32, #tpu.memory_space<vmem>>) attributes {dimension_semantics = [#tpu.dimension_semantics<parallel>], iteration_bounds = array<i64: 1>, scalar_prefetch = 0 : i64, scratch_operands = 0 : i64, tpu.core_type = #tpu.core_type<tc>, window_params = [{transform_indices = @transform_0, window_bounds = array<i64: 16, 1>}, {pipeline_mode = #tpu.pipeline_mode<synchronous>, transform_indices = @transform_1, window_bounds = array<i64: 64, 128>}, {transform_indices = @transform_2, window_bounds = array<i64: 16, 128>}]} {
    %c0 = arith.constant 0 : index
    %c0_0 = arith.constant 0 : index
    %0 = vector.load %arg1[%c0, %c0_0] : memref<16x1xi32, #tpu.memory_space<vmem>>, vector<16x1xi32>
    %1 = tpu.iota {dimensions = array<i32: 1>} : vector<16x64xi32>
    %2 = vector.broadcast %0 : vector<16x1xi32> to vector<16x64xi32>
    %3 = arith.cmpi eq, %2, %1 : vector<16x64xi32>
    %4 = arith.extui %3 : vector<16x64xi1> to vector<16x64xi32>
    %5 = arith.sitofp %4 : vector<16x64xi32> to vector<16x64xf32>
    %c0_1 = arith.constant 0 : index
    %c0_2 = arith.constant 0 : index
    %6 = vector.load %arg2[%c0_1, %c0_2] : memref<64x128xf32, #tpu.memory_space<vmem>>, vector<64x128xf32>
    %cst = arith.constant dense<0.000000e+00> : vector<16x128xf32>
    %7 = tpu.matmul %5, %6, %cst {dimension_numbers = #tpu.dot_dimension_numbers<[1], [0], [0], [1], [0, 0, 1, 1], [], []>} : vector<16x64xf32>, vector<64x128xf32>, vector<16x128xf32> -> vector<16x128xf32>
    %cst_3 = arith.constant 11.3137083 : f32
    %8 = vector.broadcast %cst_3 : f32 to vector<16x128xf32>
    %9 = arith.mulf %7, %8 : vector<16x128xf32>
    %c0_4 = arith.constant 0 : index
    %c0_5 = arith.constant 0 : index
    %10 = vector.load %arg3[%c0_4, %c0_5] : memref<16x128xf32, #tpu.memory_space<vmem>>, vector<16x128xf32>
    tpu.vector_store %arg3[%c0_4, %c0_5], %9 {strides = array<i32>} : memref<16x128xf32, #tpu.memory_space<vmem>>, vector<16x128xf32>,
    return
  }
  func.func @transform_0(%arg0: i32) -> (i32, i32) {
    %c0_i32 = arith.constant 0 : i32
    %c0_i32_0 = arith.constant 0 : i32
    return %arg0, %c0_i32 : i32, i32
  }
  func.func @transform_1(%arg0: i32) -> (i32, i32) {
    %c0_i32 = arith.constant 0 : i32
    %c0_i32_0 = arith.constant 0 : i32
    %c0_i32_1 = arith.constant 0 : i32
    return %c0_i32, %c0_i32_0 : i32, i32
  }
  func.func @transform_2(%arg0: i32) -> (i32, i32) {
    %c0_i32 = arith.constant 0 : i32
    %c0_i32_0 = arith.constant 0 : i32
    return %arg0, %c0_i32 : i32, i32
  }
}

</mosaic_0001>

<bundles_post_ra>
// kernel: tpu_custom_call.1
= control target key start
LH: loop header
LB: loop body
LE: loop exit
PB: predicated region body
PF: predicated region fallthrough
CT: control target
= control target key end

     0   :  { %7 = vsyncpa [#allocation3], 0  ;;  %s215_s0 = inlined_call_operand.vmem [shape: s32[16,1], index: 0, kind: input, shape index: {}]   ;;  %s216_s1 = inlined_call_operand.hbm [shape: f32[64,128], index: 1, kind: input, shape index: {}]   ;;  %s217_s2 = inlined_call_operand.hbm [shape: f32[16,128], index: 2, kind: output, shape index: {}]  }
   0x1   :  { %8 = vsyncpa [#allocation4], 0  ;;  %s15_s11 = sshll.u32 %s216_s1, 4  ;;  %s176_s12 = smov [#allocation2]   ;;  %s16_s11 = int_to_ptr.hbm [resolvable:$true] %s15_s11 }
   0x2   :  { %s17_s13 = sshll.u32 %s176_s12, 4  ;;  %s177_s14 = smov 128   ;;  %s18_s13 = int_to_ptr.vmem [resolvable:$true] %s17_s13 }
   0x3   :  { %s178_s15 = smov 8  }
   0x4   :  { %23 = dma.hbm_to_vmem [thread:$0]  %s16_s11, 1024, %s18_s13, [#allocation3], %s177_s14, %s177_s14, %s178_s15  }
   0x5   :  { %172 = dma.done.wait [#allocation3], 1024  }
   0x6   :  { %173 = vsyncadd [#allocation3], 4294966272  ;;  %v179_v0 = vmov 0   ;;  %v28_v1 = vld [vmem:[%s215_s0] sm:$0xff]  ;;  %v51_v2 = vld [vmem:[#allocation2 + $0x38] sm:$0xff]  ;;  %v30_v11 = vlaneseq  ;;  %vm52_vm0 = vcmask 523264  }
   0x7   :  { %123 = vset.pattern.permute.xlu0 %v179_v0  ;;  %67 = vmatpush.msra.mxu0 %v51_v2  ;;  %v50_v3 = vld [vmem:[#allocation2 + $0x30] sm:$0xff]  ;;  %v49_v4 = vld [vmem:[#allocation2 + $0x28] sm:$0xff]  ;;  %v48_v5 = vld [vmem:[#allocation2 + $0x20] sm:$0xff]  ;;  %v180_v14 = vmov 0.0   ;;  %s92_s22 = sshll.u32 %s217_s2, 4  ;;  %s93_s22 = int_to_ptr.hbm [resolvable:$true] %s92_s22 }
   0x8   :  { %33 = vperm.xlu0 %123, %v28_v1   ;;  %109 = vmatpush.msra.mxu1 %v51_v2  ;;  %v29_v6 = vld [vmem:[%s215_s0 + $0x8] sm:$0xff]  ;;  %v47_v7 = vld [vmem:[#allocation2 + $0x18] sm:$0xff]  ;;  %v46_v8 = vld [vmem:[#allocation2 + $0x10] sm:$0xff]  ;;  %v31_v12 = vand.u32 127, %v30_v11  ;;  %s181_s0 = smov [#allocation5]  }
   0x9   :  { %68 = vmatpush.msra.mxu0 %v50_v3  ;;  %v45_v9 = vld [vmem:[#allocation2 + $0x8] sm:$0xff]  ;;  %v44_v10 = vld [vmem:[#allocation2] sm:$0xff]  ;;  %s90_s19 = sshll.u32 %s181_s0, 4  ;;  %s91_s19 = int_to_ptr.vmem [resolvable:$true] %s90_s19 }
   0xa   :  { %110 = vmatpush.msra.mxu1 %v50_v3 }
   0xb   :  { %69 = vmatpush.msra.mxu0 %v49_v4 }
   0xc   :  { %111 = vmatpush.msra.mxu1 %v49_v4 }
   0xd   :  { %70 = vmatpush.msra.mxu0 %v48_v5 }
   0xe   :  { %112 = vmatpush.msra.mxu1 %v48_v5 }
   0xf   :  { %71 = vmatpush.msra.mxu0 %v47_v7 }
  0x10   :  { %36 = vperm.xlu0 %123, %v29_v6   ;;  %113 = vmatpush.msra.mxu1 %v47_v7 }
  0x11   :  { %72 = vmatpush.msra.mxu0 %v46_v8 }
  0x12   :  { %114 = vmatpush.msra.mxu1 %v46_v8 }
  0x13   :  { %73 = vmatpush.msra.mxu0 %v45_v9 }
  0x14   :  { %115 = vmatpush.msra.mxu1 %v45_v9 }
  0x15   :  { %74 = vmatpush.msra.mxu0 %v44_v10 }
  0x16   :  { %116 = vmatpush.msra.mxu1 %v44_v10 }
  0x7a   :  { %v34_v13 = vpop.permute.xlu0 %33 }
  0x7b   :  { %vm38_vm1 = vcmp.eq.s32.totalorder %v34_v13, %v31_v12 }
  0x7c   :  { %v105_v15 = vsel %vm38_vm1, 1.0, %v180_v14 }
  0x7d   :  { %107 = vmatmul.msk.f32.vlgmr.msra.gmra.mxu0 %vm52_vm0, %v105_v15 }
  0x82   :  { %v37_v16 = vpop.permute.xlu0 %36 }
  0x83   :  { %vm39_vm2 = vcmp.eq.s32.totalorder %v37_v16, %v31_v12 }
  0x84   :  { %v106_v17 = vsel %vm39_vm2, 1.0, %v180_v14 }
  0x85   :  { %108 = vmatmul.msk.f32.vlgmr.msra.gmra.mxu1 %vm52_vm0, %v106_v17 }
  0xfa   :  { %v76_v18 = vpop.f32.mrf.mxu0 }
  0xfb   :  { %v82_v19 = vmul.f32 11.313708, %v76_v18 }
  0xfd   :  { %84 = vst [vmem:[#allocation5] sm:$0xff] %v82_v19 }
 0x102   :  { %v79_v20 = vpop.f32.mrf.mxu1 }
 0x103   :  { %v83_v21 = vmul.f32 11.313708, %v79_v20 }
 0x105   :  { %85 = vst [vmem:[#allocation5 + $0x8] sm:$0xff] %v83_v21 }
 0x106   :  { %98 = dma.vmem_to_hbm [thread:$0]  %s91_s19, 256, %s93_s22, [#allocation4], %s177_s14, %s177_s14, %s178_s15  }
 0x107   :  { %174 = dma.done.wait [#allocation4], 256  }
 0x108   :  { %175 = vsyncadd [#allocation4], 4294967040 }
 0x109   :  { %103 = vsyncpa [#allocation3], 1 }
 0x10a   :  { %104 = vsyncpa [#allocation4], 1 }

</bundles_post_ra>
